<compile_context>
chip_gen: v6e
topology: v6e:2x2x1
jax: 0.10.0
libtpu: 0.0.40
codegen_flags: <defaults>
</compile_context>

<pallas_src>
import jax
import jax.numpy as jnp
import numpy as np
from jax import lax
from jax.experimental import pallas as pl
from jax.experimental.pallas import tpu as pltpu


def encoder_positional_kernel(tok_ref, pos_ref, lens_ref, inv_lens_ref, tbl_ref,
                              out_ref, mean_ref, acc_ref):
    i = pl.program_id(0)
    n_tiles = pl.num_programs(0)

    NR, _ = tok_ref.shape          # NR = B * TS rows, ordered (b, t_local)
    K, D = tbl_ref.shape           # K = V + P
    TS, BD = out_ref.shape         # lane-dense tile (TS, B*D)
    B = BD // D

    # Fused gather: one-hot hits both the token row (< V) and the position
    # row (>= V) of the block-diagonal table, so a single MXU matmul yields
    # concat(word_emb, pos_emb) per row.
    col = lax.broadcasted_iota(jnp.int32, (NR, K), 1)
    onehot = ((col == tok_ref[...]) | (col == pos_ref[...])).astype(jnp.float32)
    emb = jnp.dot(onehot, tbl_ref[...],
                  preferred_element_type=jnp.float32)           # (NR, D)

    # Rows are batch-major within the tile, so batch b occupies the contiguous
    # sublane block [b*TS, (b+1)*TS). Concatenating those blocks along lanes
    # gives the lane-dense (TS, B*D) layout directly (no reshape of the lane
    # dim, no integer div/mod).
    packed = jnp.concatenate(
        [emb[b * TS:(b + 1) * TS, :] for b in range(B)], axis=-1)  # (TS, BD)

    # pack_padded_sequence / pad_packed_sequence zeroing: t_global >= len[b].
    t = lax.broadcasted_iota(jnp.int32, (TS, BD), 0) + i * TS
    mask = (t < lens_ref[...]).astype(jnp.float32)
    masked = packed * mask
    out_ref[...] = masked                                        # dense 128-lane store

    # Per-batch mean: sublane reduction accumulated across sequence tiles.
    @pl.when(i == 0)
    def _():
        acc_ref[...] = jnp.zeros_like(acc_ref)

    acc_ref[...] += jnp.sum(masked, axis=0, keepdims=True)       # (1, BD)

    @pl.when(i == n_tiles - 1)
    def _():
        mean_ref[...] = acc_ref[...] * inv_lens_ref[...]


def encoder_positional_b(tokens, input_lens, word_tbl, pos_tbl, *, seq_tile=8):
    """tokens: (S, B) int, input_lens: (B,) int (sorted desc, > 0),
    word_tbl: (V, Dw) f32, pos_tbl: (P, Dp) f32 with P >= S."""
    S, B = tokens.shape
    V, Dw = word_tbl.shape
    P, Dp = pos_tbl.shape
    assert P >= S, "positional table must cover the sequence length"
    D = Dw + Dp
    BD = B * D
    TS = min(seq_tile, S)
    assert S % TS == 0, "seq_tile must divide S"
    n_tiles = S // TS
    N = S * B

    # Block-diagonal combined table: row k<V -> [word_tbl[k], 0],
    # row V+t -> [0, pos_tbl[t]]. Built once in the wrapper.
    combined = jnp.concatenate([
        jnp.concatenate([word_tbl.astype(jnp.float32),
                         jnp.zeros((V, Dp), jnp.float32)], axis=1),
        jnp.concatenate([jnp.zeros((P, Dw), jnp.float32),
                         pos_tbl.astype(jnp.float32)], axis=1)], axis=0)   # (V+P, D)

    # Token / position index columns, reordered batch-major within each
    # sequence tile so the kernel can pack to lane-dense with plain slices.
    tok_col = tokens.astype(jnp.int32).reshape(n_tiles, TS, B)
    tok_col = jnp.transpose(tok_col, (0, 2, 1)).reshape(N, 1)              # (N, 1)
    pos_col = (V + jnp.arange(S, dtype=jnp.int32)).reshape(n_tiles, 1, TS)
    pos_col = jnp.broadcast_to(pos_col, (n_tiles, B, TS)).reshape(N, 1)    # (N, 1)

    # Lane-dense length rows: lens_row[0, b*D + d] = len[b].
    lens_row = jnp.repeat(input_lens.astype(jnp.int32), D).reshape(1, BD)
    inv_lens_row = jnp.repeat(1.0 / input_lens.astype(jnp.float32),
                              D).reshape(1, BD)

    out2d, mean2d = pl.pallas_call(
        encoder_positional_kernel,
        out_shape=(jax.ShapeDtypeStruct((S, BD), jnp.float32),
                   jax.ShapeDtypeStruct((1, BD), jnp.float32)),
        grid_spec=pltpu.PrefetchScalarGridSpec(
            num_scalar_prefetch=0,
            grid=(n_tiles,),
            in_specs=[
                pl.BlockSpec((TS * B, 1), lambda i: (i, 0)),   # tokens
                pl.BlockSpec((TS * B, 1), lambda i: (i, 0)),   # position ids (+V)
                pl.BlockSpec((1, BD), lambda i: (0, 0)),       # lens (int)
                pl.BlockSpec((1, BD), lambda i: (0, 0)),       # 1/lens (f32)
                pl.BlockSpec((V + P, D), lambda i: (0, 0)),    # combined table
            ],
            out_specs=(pl.BlockSpec((TS, BD), lambda i: (i, 0)),
                       pl.BlockSpec((1, BD), lambda i: (0, 0))),
            scratch_shapes=[pltpu.VMEM((1, BD), jnp.float32)],
        ),
        # Single grid axis carries the mean reduction -> "arbitrary".
        # (v7x 2-TC split would need an independent parallel axis; with the mean
        #  reduced over the only axis we keep it sequential here.)
        compiler_params=pltpu.CompilerParams(
            dimension_semantics=("arbitrary",)),
    )(tok_col, pos_col, lens_row, inv_lens_row, combined)

    output_full = out2d.reshape(S, B, D)
    mean = mean2d.reshape(B, D)
    return output_full, mean


def _reference(tokens, input_lens, word_tbl, pos_tbl):
    """Pure numpy reference mirroring the PyTorch forward."""
    tokens = np.asarray(tokens)
    lens = np.asarray(input_lens)
    S, B = tokens.shape
    words = np.asarray(word_tbl)[tokens]                             # (S, B, Dw)
    positions = np.stack([np.arange(S)] * B, axis=1)                 # (S, B)
    pos = np.asarray(pos_tbl)[positions]                             # (S, B, Dp)
    concat = np.concatenate([words, pos], axis=2)                    # (S, B, D)
    mask = (np.arange(S)[:, None] < lens[None, :]).astype(np.float32)
    out = concat * mask[:, :, None]
    max_len = int(lens.max())
    out = out[:max_len]
    mean = out.sum(axis=0) / lens[:, None].astype(np.float32)
    return out, mean


if __name__ == "__main__":
    # module hyperparams (small, consistent with the forward)
    vocab_size = 32
    position_size = 16           # must be >= max sequence length
    word_emb_dim = 16
    positional_emb_dim = 16
    S, B = 16, 4                 # seq_len (time-major) x batch; B*(Dw+Dp) = 128

    key = jax.random.PRNGKey(0)
    k_w, k_p, k_tok = jax.random.split(key, 3)
    # nn.Embedding default init: N(0, 1)
    word_tbl = jax.random.normal(k_w, (vocab_size, word_emb_dim), jnp.float32)
    pos_tbl = jax.random.normal(k_p, (position_size, positional_emb_dim), jnp.float32)

    tokens = jax.random.randint(k_tok, (S, B), 0, vocab_size, jnp.int32)
    input_lens = jnp.array([15, 12, 9, 5], dtype=jnp.int32)  # sorted descending

    output_full, mean = encoder_positional_b(tokens, input_lens, word_tbl, pos_tbl,
                                             seq_tile=8)
    output_full = jax.block_until_ready(output_full)
    mean = jax.block_until_ready(mean)

    # pad_packed_sequence truncates to max(input_lens); lens are concrete here
    # (rows beyond max_len are already zeroed inside the kernel).
    max_len = int(np.max(np.asarray(input_lens)))
    output = output_full[:max_len]

    ref_out, ref_mean = _reference(tokens, input_lens, word_tbl, pos_tbl)
    np.testing.assert_allclose(np.asarray(output), ref_out, rtol=1e-5, atol=1e-5)
    np.testing.assert_allclose(np.asarray(mean), ref_mean, rtol=1e-5, atol=1e-5)

    print("KERNEL_OK")
</pallas_src>

<mosaic_0001>
module attributes {stable_mosaic.version = 11 : i64} {
  func.func @encoder_positional_kernel(%arg0: i32, %arg1: memref<32x1xi32, #tpu.memory_space<vmem>>, %arg2: memref<32x1xi32, #tpu.memory_space<vmem>>, %arg3: memref<1x128xi32, #tpu.memory_space<vmem>>, %arg4: memref<1x128xf32, #tpu.memory_space<vmem>>, %arg5: memref<48x32xf32, #tpu.memory_space<vmem>>, %arg6: memref<8x128xf32, #tpu.memory_space<vmem>>, %arg7: memref<1x128xf32, #tpu.memory_space<vmem>>, %arg8: memref<1x128xf32, #tpu.memory_space<vmem>>) attributes {dimension_semantics = [#tpu.dimension_semantics<arbitrary>], iteration_bounds = array<i64: 2>, scalar_prefetch = 0 : i64, scratch_operands = 1 : i64, tpu.core_type = #tpu.core_type<tc>, window_params = [{transform_indices = @transform_0, window_bounds = array<i64: 32, 1>}, {transform_indices = @transform_1, window_bounds = array<i64: 32, 1>}, {pipeline_mode = #tpu.pipeline_mode<synchronous>, transform_indices = @transform_2, window_bounds = array<i64: 1, 128>}, {pipeline_mode = #tpu.pipeline_mode<synchronous>, transform_indices = @transform_3, window_bounds = array<i64: 1, 128>}, {pipeline_mode = #tpu.pipeline_mode<synchronous>, transform_indices = @transform_4, window_bounds = array<i64: 48, 32>}, {transform_indices = @transform_5, window_bounds = array<i64: 8, 128>}, {pipeline_mode = #tpu.pipeline_mode<synchronous>, transform_indices = @transform_6, window_bounds = array<i64: 1, 128>}]} {
    %0 = tpu.iota {dimensions = array<i32: 1>} : vector<32x48xi32>
    %c0 = arith.constant 0 : index
    %c0_0 = arith.constant 0 : index
    %1 = vector.load %arg1[%c0, %c0_0] : memref<32x1xi32, #tpu.memory_space<vmem>>, vector<32x1xi32>
    %2 = vector.broadcast %1 : vector<32x1xi32> to vector<32x48xi32>
    %3 = arith.cmpi eq, %0, %2 : vector<32x48xi32>
    %c0_1 = arith.constant 0 : index
    %c0_2 = arith.constant 0 : index
    %4 = vector.load %arg2[%c0_1, %c0_2] : memref<32x1xi32, #tpu.memory_space<vmem>>, vector<32x1xi32>
    %5 = vector.broadcast %4 : vector<32x1xi32> to vector<32x48xi32>
    %6 = arith.cmpi eq, %0, %5 : vector<32x48xi32>
    %7 = arith.ori %3, %6 : vector<32x48xi1>
    %8 = arith.extui %7 : vector<32x48xi1> to vector<32x48xi32>
    %9 = arith.sitofp %8 : vector<32x48xi32> to vector<32x48xf32>
    %c0_3 = arith.constant 0 : index
    %c0_4 = arith.constant 0 : index
    %10 = vector.load %arg5[%c0_3, %c0_4] : memref<48x32xf32, #tpu.memory_space<vmem>>, vector<48x32xf32>
    %cst = arith.constant dense<0.000000e+00> : vector<32x32xf32>
    %11 = tpu.matmul %9, %10, %cst {dimension_numbers = #tpu.dot_dimension_numbers<[1], [0], [0], [1], [0, 0, 1, 1], [], []>} : vector<32x48xf32>, vector<48x32xf32>, vector<32x32xf32> -> vector<32x32xf32>
    %12 = vector.extract_strided_slice %11 {offsets = [0, 0], sizes = [8, 32], strides = [1, 1]} : vector<32x32xf32> to vector<8x32xf32>
    %13 = vector.extract_strided_slice %11 {offsets = [8, 0], sizes = [8, 32], strides = [1, 1]} : vector<32x32xf32> to vector<8x32xf32>
    %14 = vector.extract_strided_slice %11 {offsets = [16, 0], sizes = [8, 32], strides = [1, 1]} : vector<32x32xf32> to vector<8x32xf32>
    %15 = vector.extract_strided_slice %11 {offsets = [24, 0], sizes = [8, 32], strides = [1, 1]} : vector<32x32xf32> to vector<8x32xf32>
    %16 = tpu.concatenate %12, %13, %14, %15 in 1 : vector<8x32xf32>, vector<8x32xf32>, vector<8x32xf32>, vector<8x32xf32> -> vector<8x128xf32>
    %17 = tpu.iota {dimensions = array<i32: 0>} : vector<8x128xi32>
    %c8_i32 = arith.constant 8 : i32
    %18 = arith.muli %arg0, %c8_i32 : i32
    %19 = vector.broadcast %18 : i32 to vector<8x128xi32>
    %20 = arith.addi %17, %19 : vector<8x128xi32>
    %c0_5 = arith.constant 0 : index
    %c0_6 = arith.constant 0 : index
    %21 = vector.load %arg3[%c0_5, %c0_6] : memref<1x128xi32, #tpu.memory_space<vmem>>, vector<1x128xi32>
    %22 = vector.broadcast %21 : vector<1x128xi32> to vector<8x128xi32>
    %23 = arith.cmpi slt, %20, %22 : vector<8x128xi32>
    %24 = arith.extui %23 : vector<8x128xi1> to vector<8x128xi32>
    %25 = arith.sitofp %24 : vector<8x128xi32> to vector<8x128xf32>
    %26 = arith.mulf %16, %25 : vector<8x128xf32>
    %c0_7 = arith.constant 0 : index
    %c0_8 = arith.constant 0 : index
    %27 = vector.load %arg6[%c0_7, %c0_8] : memref<8x128xf32, #tpu.memory_space<vmem>>, vector<8x128xf32>
    tpu.vector_store %arg6[%c0_7, %c0_8], %26 {strides = array<i32>} : memref<8x128xf32, #tpu.memory_space<vmem>>, vector<8x128xf32>,
    %c0_i32 = arith.constant 0 : i32
    %28 = arith.cmpi eq, %arg0, %c0_i32 : i32
    %29 = arith.extui %28 : i1 to i32
    %c0_i32_9 = arith.constant 0 : i32
    %30 = arith.cmpi ne, %29, %c0_i32_9 : i32
    scf.if %30 {
      %cst_16 = arith.constant 0.000000e+00 : f32
      %39 = vector.broadcast %cst_16 : f32 to vector<1x128xf32>
      %c0_17 = arith.constant 0 : index
      %c0_18 = arith.constant 0 : index
      %40 = vector.load %arg8[%c0_17, %c0_18] : memref<1x128xf32, #tpu.memory_space<vmem>>, vector<1x128xf32>
      tpu.vector_store %arg8[%c0_17, %c0_18], %39 {strides = array<i32>} : memref<1x128xf32, #tpu.memory_space<vmem>>, vector<1x128xf32>,
    } else {
    }
    %c0_10 = arith.constant 0 : index
    %c0_11 = arith.constant 0 : index
    %31 = vector.load %arg8[%c0_10, %c0_11] : memref<1x128xf32, #tpu.memory_space<vmem>>, vector<1x128xf32>
    %cst_12 = arith.constant dense<0.000000e+00> : vector<128xf32>
    %32 = vector.multi_reduction <add>, %26, %cst_12 [0] : vector<8x128xf32> to vector<128xf32>
    %33 = vector.shape_cast %32 : vector<128xf32> to vector<1x128xf32>
    %34 = arith.addf %31, %33 : vector<1x128xf32>
    %c0_13 = arith.constant 0 : index
    %c0_14 = arith.constant 0 : index
    %35 = vector.load %arg8[%c0_13, %c0_14] : memref<1x128xf32, #tpu.memory_space<vmem>>, vector<1x128xf32>
    tpu.vector_store %arg8[%c0_13, %c0_14], %34 {strides = array<i32>} : memref<1x128xf32, #tpu.memory_space<vmem>>, vector<1x128xf32>,
    %c1_i32 = arith.constant 1 : i32
    %36 = arith.cmpi eq, %arg0, %c1_i32 : i32
    %37 = arith.extui %36 : i1 to i32
    %c0_i32_15 = arith.constant 0 : i32
    %38 = arith.cmpi ne, %37, %c0_i32_15 : i32
    scf.if %38 {
      %c0_16 = arith.constant 0 : index
      %c0_17 = arith.constant 0 : index
      %39 = vector.load %arg8[%c0_16, %c0_17] : memref<1x128xf32, #tpu.memory_space<vmem>>, vector<1x128xf32>
      %c0_18 = arith.constant 0 : index
      %c0_19 = arith.constant 0 : index
      %40 = vector.load %arg4[%c0_18, %c0_19] : memref<1x128xf32, #tpu.memory_space<vmem>>, vector<1x128xf32>
      %41 = arith.mulf %39, %40 : vector<1x128xf32>
      %c0_20 = arith.constant 0 : index
      %c0_21 = arith.constant 0 : index
      %42 = vector.load %arg7[%c0_20, %c0_21] : memref<1x128xf32, #tpu.memory_space<vmem>>, vector<1x128xf32>
      tpu.vector_store %arg7[%c0_20, %c0_21], %41 {strides = array<i32>} : memref<1x128xf32, #tpu.memory_space<vmem>>, vector<1x128xf32>,
    } else {
    }
    return
  }
  func.func @transform_0(%arg0: i32) -> (i32, i32) {
    %c0_i32 = arith.constant 0 : i32
    %c0_i32_0 = arith.constant 0 : i32
    return %arg0, %c0_i32 : i32, i32
  }
  func.func @transform_1(%arg0: i32) -> (i32, i32) {
    %c0_i32 = arith.constant 0 : i32
    %c0_i32_0 = arith.constant 0 : i32
    return %arg0, %c0_i32 : i32, i32
  }
  func.func @transform_2(%arg0: i32) -> (i32, i32) {
    %c0_i32 = arith.constant 0 : i32
    %c0_i32_0 = arith.constant 0 : i32
    %c0_i32_1 = arith.constant 0 : i32
    return %c0_i32, %c0_i32_0 : i32, i32
  }
  func.func @transform_3(%arg0: i32) -> (i32, i32) {
    %c0_i32 = arith.constant 0 : i32
    %c0_i32_0 = arith.constant 0 : i32
    %c0_i32_1 = arith.constant 0 : i32
    return %c0_i32, %c0_i32_0 : i32, i32
  }
  func.func @transform_4(%arg0: i32) -> (i32, i32) {
    %c0_i32 = arith.constant 0 : i32
    %c0_i32_0 = arith.constant 0 : i32
    %c0_i32_1 = arith.constant 0 : i32
    return %c0_i32, %c0_i32_0 : i32, i32
  }
  func.func @transform_5(%arg0: i32) -> (i32, i32) {
    %c0_i32 = arith.constant 0 : i32
    %c0_i32_0 = arith.constant 0 : i32
    return %arg0, %c0_i32 : i32, i32
  }
  func.func @transform_6(%arg0: i32) -> (i32, i32) {
    %c0_i32 = arith.constant 0 : i32
    %c0_i32_0 = arith.constant 0 : i32
    %c0_i32_1 = arith.constant 0 : i32
    return %c0_i32, %c0_i32_0 : i32, i32
  }
}

</mosaic_0001>

<bundles_post_ra>
// kernel: tpu_custom_call.1
= control target key start
LH: loop header
LB: loop body
LE: loop exit
PB: predicated region body
PF: predicated region fallthrough
CT: control target
= control target key end

     0   :  { %12 = vsyncpa [#allocation4], 0  ;;  %s1000_s0 = inlined_call_operand.vmem [shape: s32[64,1], index: 0, kind: input, shape index: {}]   ;;  %s1001_s1 = inlined_call_operand.vmem [shape: s32[64,1], index: 1, kind: input, shape index: {}]   ;;  %s1002_s2 = inlined_call_operand.vmem [shape: s32[1,128], index: 2, kind: input, shape index: {}]   ;;  %s1003_s3 = inlined_call_operand.vmem [shape: f32[1,128], index: 3, kind: input, shape index: {}]   ;;  %s1004_s4 = inlined_call_operand.vmem [shape: f32[48,32], index: 4, kind: input, shape index: {}]   ;;  %s1005_s5 = inlined_call_operand.hbm [shape: f32[16,128], index: 5, kind: output, shape index: {0}]   ;;  %s1006_s6 = inlined_call_operand.hbm [shape: f32[1,128], index: 6, kind: output, shape index: {1}]  }
   0x1   :  { %14 = vsyncpa [#allocation4 + $0x1], 0 }
   0x2   :  { %15 = vsyncpa [#allocation6], 0  ;;  %s848_s21 = smov 0   ;;  %s850_s22 = smov 0  }
   0x3   :  { %s852_s23 = smov 0   ;;  %s854_s24 = smov 0  }
   0x4 LB: > { %s869_s25 = sadd.s32 4294967295, %s803_s24   ;;  %s593_s26 = sadd.s32 4294967294, %s803_s24   ;;  %s803_s24 = sphi %s854_s24, %s1018_s24   ;;  %s799_s23 = sphi %s852_s23, %s1017_s23   ;;  %s795_s22 = sphi %s850_s22, %s1016_s22   ;;  %s791_s21 = sphi %s848_s21, %s1015_s21  }
   0x5   : > { %s873_s27 = sadd.s32 1, %s803_s24   ;;  %s143_s28 = sadd.s32 1, %s799_s23 }
   0x6   : > { %s140_s29 = ssub.s32 %s803_s24, %s873_s27  ;;  %p153_p0 = scmp.ne.s32.totalorder %s799_s23, %s795_s22 }
   0x7   : > { %p141_p1 = scmp.eq.s32.totalorder %s140_s29, 0  ;;  %p1007_p2 = scmp.eq.s32.totalorder %s869_s25, 1 }
   0x8   : > { %p159_p3 = scmp.ne.s32.totalorder %s795_s22, %s791_s21  ;;  %p160_p4 = scmp.eq.s32.totalorder %s593_s26, 1 }
   0x9   : > { %s884_s30 = scalar_select %p141_p1, %s799_s23, %s143_s28  }
   0xa   : > { %p888_p5 = por %p1007_p2, %p153_p0  ;;  %p892_p6 = por %p160_p4, %p159_p3 }
   0xb   : > { %p596_p7 = scmp.ge.s32.totalorder %s803_s24, 1  ;;  %p226_p8 = scmp.lt.s32.totalorder %s803_s24, 3 }
   0xc   : > { %s1009_s8 = scalar_select %p892_p6, 1, 0 }
   0xd   : > { %p227_p9 = pnand %p596_p7, %p226_p8 }
   0xe   : > { %s598_s9 = sshll.u32 (!%p227_p9), %s869_s25, 2  ;;  %s807_s14 = smov (!%p227_p9), 64  }
   0xf   : > { %230 = sbr.rel (%p227_p9) target bundleno = 551 (0x227), region = 40  ;;  %p262_p10 = scmp.lt.s32.totalorder (!%p227_p9), %s598_s9, 7 }
  0x10   : > { %s808_s15 = smov (!%p227_p9), 32   ;;  %s610_s17 = sshll.u32 (!%p227_p9), %s869_s25, 3 }
  0x11   : > { %s256_s20 = sand.u32 (!%p227_p9), 1, %s795_s22   ;;  %p613_p11 = scmp.ne.s32.totalorder (!%p227_p9), %s869_s25, 0 }
  0x12   : > { %s946_s26 = sshll.u32 (!%p227_p9), %s256_s20, 3 }
  0x14   : > { %v332_v0 = vld [vmem:[%s1004_s4 + $0x28] sm:$0xff]  ;;  %v805_v1 = vmov 0   ;;  %s1020_s9 = smov (!%p262_p10, %s598_s9), 7  ;;  %v331_v2 = vld [vmem:[%s1004_s4 + $0x20] sm:$0xff]  ;;  %v330_v3 = vld [vmem:[%s1004_s4 + $0x18] sm:$0xff]  ;;  %v273_v15 = vlaneseq  ;;  %vm333_vm2 = vcmask 392192   ;;  %v452_v34 = vstv %s610_s17 }
  0x15   : > { %714 = vset.pattern.permute.xlu1 %v805_v1  ;;  %713 = vset.pattern.permute.xlu0 %v805_v1  ;;  %s599_s16 = sshll.u32 %s1020_s9, 3  ;;  %v329_v8 = vld [vmem:[%s1004_s4 + $0x10] sm:$0xff]  ;;  %v328_v9 = vld [vmem:[%s1004_s4 + $0x8] sm:$0xff]  ;;  %v327_v10 = vld [vmem:[%s1004_s4] sm:$0xff]  ;;  %v806_v21 = vmov 0.0   ;;  %vm443_vm13 = vcmask 261120  }
  0x16   : > { %649 = vmatprep.subr.mxu1 %v332_v0  ;;  %631 = vmatprep.subr.mxu0 %v332_v0  ;;  %s911_s19 = scalar_lea.vmem %s1000_s0, %s599_s16  ;;  %s916_s28 = scalar_lea.vmem %s1001_s1, %s599_s16  ;;  %v274_v18 = vand.u32 127, %v273_v15  ;;  %v450_v33 = vshrl.u32 %v273_v15, 7  ;;  %v611_v36 = vld [vmem:[%s1002_s2] ss:$0 sm:$0xff]  ;;  %vm445_vm15 = vcmask 523264  }
  0x17   : > { %655 = vmatpush3.msra.mxu1 %v332_v0  ;;  %632 = vmatpush3.msra.mxu0 %v332_v0  ;;  %v277_v4 = vld [vmem:[%s911_s19 + $0x10] sm:$0xff]  ;;  %v275_v5 = vld [vmem:[%s911_s19] sm:$0xff]  ;;  %v278_v7 = vld [vmem:[%s911_s19 + $0x18] sm:$0xff]  ;;  %s809_s16 = smov 96  }
  0x18   : > { %650 = vmatprep.subr.mxu1 %v331_v2  ;;  %633 = vmatprep.subr.mxu0 %v331_v2  ;;  %v297_v6 = vld [vmem:[%s916_s28 + $0x10] sm:$0xff]  ;;  %v295_v11 = vld [vmem:[%s916_s28] sm:$0xff]  ;;  %v298_v12 = vld [vmem:[%s916_s28 + $0x18] sm:$0xff]  ;;  %v453_v35 = vadd.s32 %v452_v34, %v450_v33 }
  0x19   : > { %656 = vmatpush3.msra.mxu1 %v331_v2  ;;  %634 = vmatpush3.msra.mxu0 %v331_v2  ;;  %v276_v13 = vld [vmem:[%s911_s19 + $0x8] sm:$0xff] }
  0x1a   : > { %651 = vmatprep.subr.mxu1 %v330_v3  ;;  %635 = vmatprep.subr.mxu0 %v330_v3  ;;  %v296_v14 = vld [vmem:[%s916_s28 + $0x8] sm:$0xff]  ;;  %vm459_vm14 = vcmp.lt.s32.totalorder %v453_v35, %v611_v36  ;;  %s258_s28 = scalar_lea.vmem [#allocation3], %s946_s26 }
  0x1b   : > { %286 = vperm.xlu0 %713, %v277_v4   ;;  %280 = vperm.xlu1 %714, %v275_v5   ;;  %v612_v41 = vsel %vm459_vm14, 1.0, %v806_v21 }
  0x1c   : > { %657 = vmatpush3.msra.mxu1 %v330_v3  ;;  %636 = vmatpush3.msra.mxu0 %v330_v3 }
  0x1d   : > { %652 = vmatprep.subr.mxu1 %v329_v8  ;;  %637 = vmatprep.subr.mxu0 %v329_v8 }
  0x1e   : > { %658 = vmatpush3.msra.mxu1 %v329_v8  ;;  %638 = vmatpush3.msra.mxu0 %v329_v8 }
  0x1f   : > { %306 = vperm.xlu0 %713, %v297_v6   ;;  %289 = vperm.xlu1 %714, %v278_v7  }
  0x20   : > { %653 = vmatprep.subr.mxu1 %v328_v9  ;;  %639 = vmatprep.subr.mxu0 %v328_v9 }
  0x21   : > { %659 = vmatpush3.msra.mxu1 %v328_v9  ;;  %640 = vmatpush3.msra.mxu0 %v328_v9 }
  0x22   : > { %654 = vmatprep.subr.mxu1 %v327_v10  ;;  %641 = vmatprep.subr.mxu0 %v327_v10 }
  0x23   : > { %300 = vperm.xlu0 %713, %v295_v11   ;;  %309 = vperm.xlu1 %714, %v298_v12  }
  0x24   : > { %660 = vmatpush3.msra.mxu1 %v327_v10  ;;  %642 = vmatpush3.msra.mxu0 %v327_v10 }
  0x27   : > { %283 = vperm.xlu0 %713, %v276_v13   ;;  %303 = vperm.xlu1 %714, %v296_v14  }
  0x96   : > { %v287_v16 = vpop.permute.xlu0 %286  ;;  %v281_v17 = vpop.permute.xlu1 %280 }
  0x97   : > { %vm293_vm0 = vcmp.eq.s32.totalorder %v274_v18, %v287_v16  ;;  %vm291_vm7 = vcmp.eq.s32.totalorder %v274_v18, %v281_v17 }
  0x9a   : > { %v307_v19 = vpop.permute.xlu0 %306  ;;  %v290_v20 = vpop.permute.xlu1 %289 }
  0x9b   : > { %vm313_vm1 = vcmp.eq.s32.totalorder %v274_v18, %v307_v19  ;;  %vm294_vm4 = vcmp.eq.s32.totalorder %v274_v18, %v290_v20 }
  0x9c   : > { %vm317_vm3 = vmor %vm293_vm0, %vm313_vm1  ;;  %vm447_vm0 = vcmask 785408  }
  0x9d   : > { %v604_v22 = vsel %vm317_vm3, 1.0, %v806_v21 }
  0x9e   : > { %646 = vmatprep.mubr.msk.f32.mxu1 %vm333_vm2, %v604_v22  ;;  %v301_v23 = vpop.permute.xlu0 %300  ;;  %v310_v24 = vpop.permute.xlu1 %309 }
  0x9f   : > { %vm311_vm5 = vcmp.eq.s32.totalorder %v274_v18, %v301_v23  ;;  %vm314_vm6 = vcmp.eq.s32.totalorder %v274_v18, %v310_v24 }
  0xa0   : > { %vm318_vm8 = vmor %vm294_vm4, %vm314_vm6 }
  0xa1   : > { %v605_v25 = vsel %vm318_vm8, 1.0, %v806_v21  ;;  %vm315_vm9 = vmor %vm291_vm7, %vm311_vm5 }
  0xa2   : > { %v284_v26 = vpop.permute.xlu0 %283  ;;  %v602_v27 = vsel %vm315_vm9, 1.0, %v806_v21  ;;  %647 = vmatmul.mubr.msk.f32.vlgmr.msra.gmra.mxu1 %vm333_vm2, %v605_v25  ;;  %v304_v28 = vpop.permute.xlu1 %303 }
  0xa3   : > { %vm292_vm10 = vcmp.eq.s32.totalorder %v274_v18, %v284_v26  ;;  %643 = vmatprep.mubr.msk.f32.mxu0 %vm333_vm2, %v602_v27  ;;  %vm312_vm11 = vcmp.eq.s32.totalorder %v274_v18, %v304_v28 }
  0xa4   : > { %vm316_vm12 = vmor %vm292_vm10, %vm312_vm11 }
  0xa5   : > { %v603_v29 = vsel %vm316_vm12, 1.0, %v806_v21 }
  0xa6   : > { %644 = vmatmul.mubr.msk.f32.vlgmr.msra.gmra.mxu0 %vm333_vm2, %v603_v29 }
 0x162   : > { %v648_v30 = vpop.f32.mrf.mxu1 }
 0x164   : > { %v422_v31 = vpop.f32.mrf.mxu1 }
 0x165   : > { %436 = vrot.lane.b32.xlu1 %v422_v31, %s807_s14 }
 0x166   : > { %v645_v32 = vpop.f32.mrf.mxu0 }
 0x167   : > { %432 = vrot.lane.b32.xlu0 %v645_v32, %s808_s15 }
 0x168   : > { %v412_v37 = vpop.f32.mrf.mxu0 }
 0x16b   : > { %440 = vrot.lane.b32.xlu0 %v648_v30, %s809_s16 }
 0x1d7   : > { %v437_v40 = vpop.permute.xlu1 %436 }
 0x1d9   : > { %v433_v38 = vpop.permute.xlu0 %432 }
 0x1da   : > { %v444_v39 = vsel %vm443_vm13, %v412_v37, %v433_v38 }
 0x1db   : > { %v446_v43 = vsel %vm445_vm15, %v444_v39, %v437_v40 }
 0x1dd   : > { %v441_v42 = vpop.permute.xlu0 %440  ;;  %467 = sbr.rel (%p613_p11) target bundleno = 484 (0x1e4), region = 44 }
 0x1de   : > { %v448_v44 = vsel %vm447_vm0, %v446_v43, %v441_v42 }
 0x1df   : > { %v462_v45 = vmul.f32 %v612_v41, %v448_v44 }
 0x1e1   : > { %463 = vst [vmem:[%s258_s28] sm:$0xff] %v462_v45 }
 0x1e2   : > { %v810_v46 = vmov 0.0  }
 0x1e3   : > { %468 = vst [vmem:[#allocation2] sm:$0x1] %v810_v46 }
 0x1e4 PF: > { %v470_v47 = vrot.slane %v462_v45, 4  ;;  %p614_p12 = scmp.ne.s32.totalorder %s869_s25, 1 }
 0x1e6   : > { %v471_v48 = vadd.f32 %v470_v47, %v462_v45 }
 0x1e8   : > { %v472_v49 = vrot.slane %v471_v48, 2 }
 0x1ea   : > { %v473_v50 = vadd.f32 %v472_v49, %v471_v48  ;;  %v469_v52 = vld [vmem:[#allocation2] sm:$0x1] }
 0x1ec   : > { %v474_v51 = vrot.slane %v473_v50, 1 }
 0x1ee   : > { %v475_v53 = vadd.f32 %v474_v51, %v473_v50  ;;  %481 = sbr.rel (%p614_p12) target bundleno = 509 (0x1fd), region = 48 }
 0x1f0   : > { %v476_v54 = vadd.f32 %v475_v53, %v469_v52 }
 0x1f2   : > { %477 = vst [vmem:[#allocation2] sm:$0x1] %v476_v54 }
 0x1f3   : > { %v483_v56 = vld [vmem:[%s1003_s3] sm:$0x1] }
 0x1f9   : > { %v482_v55 = vld [vmem:[#allocation2] sm:$0x1] }
 0x1fa   : > { %v484_v57 = vmul.f32 %v483_v56, %v482_v55 }
 0x1fc   : > { %485 = vst [vmem:[#allocation5] sm:$0x1] %v484_v57 }
 0x1fd PF: > { %s616_s10 = sshll.u32 %s869_s25, 7  ;;  %s500_s14 = sshll.u32 %s258_s28, 4  ;;  %s501_s14 = int_to_ptr.vmem [resolvable:$true] %s500_s14 }
 0x1fe   : > { %s498_s13 = scalar_lea.hbm %s1005_s5, %s616_s10  ;;  %s487_s15 = scalar_lea.sflag [#allocation4], %s256_s20 }
 0x1ff   : > { %s715_s16 = scalar_lea.vmem %s501_s14, 128  ;;  %s811_s17 = smov [#allocation3]  }
 0x200   : > { %p716_p13 = scmp.ne.s32.totalorder %s501_s14, %s715_s16  ;;  %s719_s18 = sshll.u32 %s811_s17, 4  ;;  %s720_s18 = int_to_ptr.vmem [resolvable:$false] %s719_s18 }
 0x201   : > { %s721_s19 = scalar_lea.vmem %s720_s18, 256  ;;  %p722_p3 = scmp.lt.s32.totalorder %s501_s14, %s720_s18 }
 0x202   : > { %p717_p0 = pnand %p716_p13, %p888_p5  ;;  %p723_p4 = scmp.lt.s32.totalorder %s721_s19, %s715_s16 }
 0x204   : > { %p718_p1 = pneg %p717_p0  ;;  %p724_p7 = por %p723_p4, %p722_p3 }
 0x206   : > { %p725_p8 = pnand %p724_p7, %p718_p1 }
 0x208   : > { %728 = shalt.err (!%p725_p8)
}
 0x209   : > { %s729_s26 = scalar_lea.hbm %s498_s13, 128  ;;  %s733_s29 = scalar_lea.hbm %s1005_s5, 256 }
 0x20a   : > { %p730_p9 = scmp.ne.s32.totalorder %s498_s13, %s729_s26  ;;  %p734_p12 = scmp.lt.s32.totalorder %s498_s13, %s1005_s5 }
 0x20b   : > { %p735_p13 = scmp.lt.s32.totalorder %s733_s29, %s729_s26 }
 0x20c   : > { %p731_p10 = pnand %p730_p9, %p888_p5 }
 0x20d   : > { %p736_p0 = por %p735_p13, %p734_p12 }
 0x20e   : > { %p732_p11 = pneg %p731_p10 }
 0x210   : > { %p737_p2 = pnand %p736_p0, %p732_p11 }
 0x212   : > { %740 = shalt.err (!%p737_p2)
}
 0x213   : > { %661 = dma.vmem_to_hbm [thread:$0]  (%p888_p5), %s501_s14, 128, %s498_s13, %s487_s15  }
 0x214   : > { %s812_s11 = smov [#allocation5]   ;;  %p1010_p3 = scmp.eq.s32.totalorder %s869_s25, 1 }
 0x215   : > { %s511_s12 = sshll.u32 %s812_s11, 4  ;;  %s512_s12 = int_to_ptr.vmem [resolvable:$true] %s511_s12 }
 0x216   : > { %s741_s16 = scalar_lea.vmem %s512_s12, 16  ;;  %s747_s17 = scalar_lea.vmem %s512_s12, 32 }
 0x217   : > { %p742_p1 = scmp.ne.s32.totalorder %s512_s12, %s741_s16  ;;  %p748_p8 = scmp.lt.s32.totalorder %s512_s12, %s512_s12 }
 0x218   : > { %p749_p9 = scmp.lt.s32.totalorder %s747_s17, %s741_s16 }
 0x219   : > { %p743_p4 = pnand %p742_p1, %p1010_p3 }
 0x21a   : > { %p750_p10 = por %p749_p9, %p748_p8 }
 0x21b   : > { %p744_p7 = pneg %p743_p4 }
 0x21d   : > { %p751_p6 = pnand %p750_p10, %p744_p7 }
 0x21f   : > { %754 = shalt.err (!%p751_p6)
}
 0x220   : > { %p1011_p2 = pmov %p1010_p3 }
 0x222   : > { %663 = dma.vmem_to_hbm [thread:$0]  (%p1011_p2), %s512_s12, 16, %s1006_s6, [#allocation6]  }
 0x223   : > { %p1012_p5 = pmov %p1011_p2 }
 0x224   : > { %p1013_p11 = pmov %p1011_p2 }
 0x225   : > { %782 = dma.done.wait (%p1012_p5), [#allocation6], 16  }
 0x226   : > { %784 = vsyncadd (%p1013_p11), [#allocation6], 4294967280 }
 0x227 PF: > { %p673_p12 = scmp.ge.s32.totalorder %s803_s24, 2  ;;  %s527_s13 = sand.u32 1, %s791_s21  }
 0x228   : > { %p1014_p13 = scmp.ne.s32.totalorder %s1009_s8, 0  ;;  %s528_s14 = scalar_lea.sflag [#allocation4], %s527_s13 }
 0x22a   : > { %p668_p6 = pnand %p673_p12, %p1014_p13 }
 0x22c   : > { %p669_p0 = pneg %p668_p6 }
 0x22e   : > { %786 = dma.done.wait (%p669_p0), %s528_s14, 128  }
 0x22f   : > { %788 = vsyncadd (%p669_p0), %s528_s14, 4294967168  ;;  %p18_p1 = scmp.ge.s32.totalorder %s873_s27, 4   ;;  %s1015_s21 = smov %s795_s22 }
 0x230   : > { %s1016_s22 = smov %s799_s23  ;;  %s1017_s23 = smov %s884_s30 }
 0x231   : > { %s1018_s24 = smov %s873_s27  ;;  %20 = sbr.rel (!%p18_p1) target bundleno = 4 (0x4), region = 94 }
 0x236   :  { %533 = vsyncpa [#allocation4], 1 }
 0x237   :  { %535 = vsyncpa [#allocation4 + $0x1], 1 }
 0x238   :  { %536 = vsyncpa [#allocation6], 1 }

</bundles_post_ra>
